<compile_context>
chip_gen: v7x
topology: tpu7x:2x2x1
jax: 0.10.0
libtpu: 0.0.40
codegen_flags: <defaults>
</compile_context>

<pallas_src>
import functools

import jax
import jax.numpy as jnp
from jax import lax
from jax.experimental import pallas as pl
from jax.experimental.pallas import tpu as pltpu


_ACT = {
    "relu": lambda v: jnp.maximum(v, 0.0),
    "gelu": jax.nn.gelu,
    "tanh": jnp.tanh,
}


def _pairwise_fc3_kernel(act, a_ref, bm_ref, w3_ref, b3_ref, out_ref):
    """Pairwise fc2-sum + activation + fc3 for one (batch, i-row-block) tile.

    a_ref  : (1, TI, Hh)   A[b, i_block]  (s-side fc2 half, fc2 bias folded in)
    bm_ref : (1, L,  Hh)   Bm[b, :]       (t-side fc2 half)
    w3_ref : (C, Hh)       fc3 weight
    b3_ref : (C, 1)        fc3 bias as a column
    out_ref: (1, TI, C, L) out[b, i, c, j]  (already permuted, lane-dense in j)
    """
    ti = a_ref.shape[1]
    L = bm_ref.shape[1]
    C = w3_ref.shape[0]

    # Hoisted once per grid step (JAX does not CSE broadcast_in_dim in loops).
    bm = bm_ref[0]                                     # (L, Hh)
    w3 = w3_ref[...]                                   # (C, Hh)
    b3 = jnp.broadcast_to(b3_ref[...], (C, L))         # (C, L)

    def body(t, carry):
        # Row i = t of this block, broadcast against all j rows.
        z = act(a_ref[0, pl.ds(t, 1), :] + bm)         # (L, Hh)
        # fc3 in transposed form: contract Hh of both operands -> (C, L) tile
        # directly (no transpose; output last dim is the j/lane dimension).
        o = lax.dot_general(w3, z, (((1,), (1,)), ((), ())),
                            preferred_element_type=jnp.float32) + b3
        out_ref[0, t] = o.astype(out_ref.dtype)
        return carry

    lax.fori_loop(0, ti, body, 0, unroll=True if ti <= 32 else 8)


def _pick_block_rows(L, max_rows=256):
    """Query rows handled per grid step (amortize per-step fixed overhead)."""
    if L <= max_rows:
        return L
    for ti in (256, 128):
        if L % ti == 0:
            return ti
    return L  # fall back to whole-L blocks if L has no convenient divisor


def linear_layer2(x, w_s, b_s, w_t, b_t, w2, b2, w3, b3,
                  activation="relu", block_rows=None):
    """Pallas forward of LinearLayer2.

    x: (B, L, Hin). w_s/w_t: (Hh, Hin), b_s/b_t: (Hh,), w2: (Hh, 2*Hh),
    b2: (Hh,), w3: (C, Hh), b3: (C,).  Returns (B, L, C, L).
    """
    B, L, Hin = x.shape
    Hh = w_s.shape[0]
    C = w3.shape[0]
    assert w2.shape == (Hh, 2 * Hh), (w2.shape, Hh)
    act = _ACT[activation]

    # ---- hoisted precompute: plain XLA dense matmuls (near-peak MXU) ----
    hs = act(x @ w_s.T + b_s)                  # (B, L, Hh)  act(s_fc(x))
    ht = act(x @ w_t.T + b_t)                  # (B, L, Hh)  act(t_fc(x))
    a = (hs @ w2[:, :Hh].T + b2).astype(jnp.float32)   # s half of fc2 (+bias)
    bm = (ht @ w2[:, Hh:].T).astype(jnp.float32)       # t half of fc2

    ti = _pick_block_rows(L) if block_rows is None else block_rows
    assert L % ti == 0, (L, ti)
    grid = (B, L // ti)

    # VMEM budget: double-buffered blocks + headroom (keeps v7x's 64 MiB honest).
    itemsize = 4
    vmem_est = itemsize * (2 * ti * Hh + 2 * L * Hh + 2 * ti * C * L
                           + 2 * C * Hh + 2 * C)
    vmem_limit = int(min(max(vmem_est + (1 << 20), 4 << 20), 96 << 20))

    kernel = functools.partial(_pairwise_fc3_kernel, act)

    return pl.pallas_call(
        kernel,
        out_shape=jax.ShapeDtypeStruct((B, L, C, L), jnp.float32),
        grid_spec=pltpu.PrefetchScalarGridSpec(
            num_scalar_prefetch=0,
            grid=grid,
            in_specs=[
                pl.BlockSpec((1, ti, Hh), lambda b, ib: (b, ib, 0)),  # A rows i
                pl.BlockSpec((1, L, Hh), lambda b, ib: (b, 0, 0)),    # Bm all j
                pl.BlockSpec((C, Hh), lambda b, ib: (0, 0)),          # w3
                pl.BlockSpec((C, 1), lambda b, ib: (0, 0)),           # b3
            ],
            out_specs=pl.BlockSpec((1, ti, C, L), lambda b, ib: (b, ib, 0, 0)),
        ),
        compiler_params=pltpu.CompilerParams(
            dimension_semantics=("parallel", "parallel"),
            vmem_limit_bytes=vmem_limit),
    )(a, bm, w3.astype(jnp.float32), b3.reshape(C, 1).astype(jnp.float32))


def _reference(x, w_s, b_s, w_t, b_t, w2, b2, w3, b3):
    """Pure-JAX replica of the PyTorch forward, for correctness checking."""
    act = _ACT["relu"]
    s = act(x @ w_s.T + b_s)                                    # (B, L, Hh)
    t = act(x @ w_t.T + b_t)                                    # (B, L, Hh)
    B, L, Hh = s.shape
    se = jnp.broadcast_to(s[:, :, None, :], (B, L, L, Hh))      # expand over j
    te = jnp.broadcast_to(t[:, None, :, :], (B, L, L, Hh))      # expand over i
    cat = jnp.concatenate([se, te], axis=-1)                    # (B, L, L, 2Hh)
    z = act(cat @ w2.T + b2)                                    # act(fc2)
    o = z @ w3.T + b3                                           # (B, L, L, C)
    return jnp.transpose(o, (0, 1, 3, 2))                       # (B, L, C, L)


if __name__ == "__main__":
    B, L, Hin, Hh, C = 2, 8, 32, 32, 4

    key = jax.random.PRNGKey(0)
    ks = jax.random.split(key, 10)
    x = jax.random.normal(ks[0], (B, L, Hin), jnp.float32)

    # Deterministic init mimicking nn.Linear defaults + fc3.weight.normal_()
    bnd1 = 1.0 / (Hin ** 0.5)
    w_s = jax.random.uniform(ks[1], (Hh, Hin), jnp.float32, -bnd1, bnd1)
    b_s = jax.random.uniform(ks[2], (Hh,), jnp.float32, -bnd1, bnd1)
    w_t = jax.random.uniform(ks[3], (Hh, Hin), jnp.float32, -bnd1, bnd1)
    b_t = jax.random.uniform(ks[4], (Hh,), jnp.float32, -bnd1, bnd1)
    bnd2 = 1.0 / ((2 * Hh) ** 0.5)
    w2 = jax.random.uniform(ks[5], (Hh, 2 * Hh), jnp.float32, -bnd2, bnd2)
    b2 = jax.random.uniform(ks[6], (Hh,), jnp.float32, -bnd2, bnd2)
    w3 = jax.random.normal(ks[7], (C, Hh), jnp.float32)   # fc3.weight.data.normal_()
    bnd3 = 1.0 / (Hh ** 0.5)
    b3 = jax.random.uniform(ks[8], (C,), jnp.float32, -bnd3, bnd3)

    out = jax.block_until_ready(
        linear_layer2(x, w_s, b_s, w_t, b_t, w2, b2, w3, b3))
    assert out.shape == (B, L, C, L), out.shape

    ref = _reference(x, w_s, b_s, w_t, b_t, w2, b2, w3, b3)
    if not jnp.allclose(out, ref, atol=1e-4, rtol=1e-4):
        err = float(jnp.max(jnp.abs(out - ref)))
        raise AssertionError(f"Pallas kernel does not match reference (max err {err})")

    print("KERNEL_OK")
</pallas_src>

<mosaic_0001>
module attributes {stable_mosaic.version = 11 : i64} {
  func.func @_pairwise_fc3_kernel(%arg0: i32, %arg1: i32, %arg2: memref<1x8x32xf32, #tpu.memory_space<vmem>>, %arg3: memref<1x8x32xf32, #tpu.memory_space<vmem>>, %arg4: memref<4x32xf32, #tpu.memory_space<vmem>>, %arg5: memref<4x1xf32, #tpu.memory_space<vmem>>, %arg6: memref<1x8x4x8xf32, #tpu.memory_space<vmem>>) attributes {dimension_semantics = [#tpu.dimension_semantics<parallel>, #tpu.dimension_semantics<parallel>], iteration_bounds = array<i64: 2, 1>, scalar_prefetch = 0 : i64, scratch_operands = 0 : i64, tpu.core_type = #tpu.core_type<tc>, window_params = [{transform_indices = @transform_0, window_bounds = array<i64: 1, 8, 32>}, {transform_indices = @transform_1, window_bounds = array<i64: 1, 8, 32>}, {pipeline_mode = #tpu.pipeline_mode<synchronous>, transform_indices = @transform_2, window_bounds = array<i64: 4, 32>}, {pipeline_mode = #tpu.pipeline_mode<synchronous>, transform_indices = @transform_3, window_bounds = array<i64: 4, 1>}, {transform_indices = @transform_4, window_bounds = array<i64: 1, 8, 4, 8>}]} {
    %c0 = arith.constant 0 : index
    %c0_0 = arith.constant 0 : index
    %c0_1 = arith.constant 0 : index
    %0 = vector.load %arg3[%c0, %c0_0, %c0_1] : memref<1x8x32xf32, #tpu.memory_space<vmem>>, vector<1x8x32xf32>
    %1 = vector.shape_cast %0 : vector<1x8x32xf32> to vector<8x32xf32>
    %c0_2 = arith.constant 0 : index
    %c0_3 = arith.constant 0 : index
    %2 = vector.load %arg4[%c0_2, %c0_3] : memref<4x32xf32, #tpu.memory_space<vmem>>, vector<4x32xf32>
    %c0_4 = arith.constant 0 : index
    %c0_5 = arith.constant 0 : index
    %3 = vector.load %arg5[%c0_4, %c0_5] : memref<4x1xf32, #tpu.memory_space<vmem>>, vector<4x1xf32>
    %4 = vector.shape_cast %3 : vector<4x1xf32> to vector<4x1xf32>
    %5 = vector.broadcast %4 : vector<4x1xf32> to vector<4x8xf32>
    %c0_i32 = arith.constant 0 : i32
    %c0_6 = arith.constant 0 : index
    %6 = arith.index_cast %c0_i32 : i32 to index
    %c0_7 = arith.constant 0 : index
    %7 = vector.load %arg2[%c0_6, %6, %c0_7] : memref<1x8x32xf32, #tpu.memory_space<vmem>>, vector<1x1x32xf32>
    %8 = vector.shape_cast %7 : vector<1x1x32xf32> to vector<1x32xf32>
    %9 = vector.broadcast %8 : vector<1x32xf32> to vector<8x32xf32>
    %10 = arith.addf %9, %1 : vector<8x32xf32>
    %cst = arith.constant 0.000000e+00 : f32
    %11 = vector.broadcast %cst : f32 to vector<8x32xf32>
    %12 = arith.maximumf %10, %11 : vector<8x32xf32>
    %cst_8 = arith.constant dense<0.000000e+00> : vector<4x8xf32>
    %13 = tpu.matmul %2, %12, %cst_8 {dimension_numbers = #tpu.dot_dimension_numbers<[1], [1], [0], [0], [0, 0, 1, 0], [], []>} : vector<4x32xf32>, vector<8x32xf32>, vector<4x8xf32> -> vector<4x8xf32>
    %14 = arith.addf %13, %5 : vector<4x8xf32>
    %c0_9 = arith.constant 0 : index
    %15 = arith.index_cast %c0_i32 : i32 to index
    %c0_10 = arith.constant 0 : index
    %c0_11 = arith.constant 0 : index
    %16 = vector.load %arg6[%c0_9, %15, %c0_10, %c0_11] : memref<1x8x4x8xf32, #tpu.memory_space<vmem>>, vector<1x1x4x8xf32>
    %17 = vector.shape_cast %16 : vector<1x1x4x8xf32> to vector<4x8xf32>
    %18 = vector.shape_cast %14 : vector<4x8xf32> to vector<1x1x4x8xf32>
    tpu.vector_store %arg6[%c0_9, %15, %c0_10, %c0_11], %18 {strides = array<i32>} : memref<1x8x4x8xf32, #tpu.memory_space<vmem>>, vector<1x1x4x8xf32>,
    %c1_i32 = arith.constant 1 : i32
    %c0_12 = arith.constant 0 : index
    %19 = arith.index_cast %c1_i32 : i32 to index
    %c0_13 = arith.constant 0 : index
    %20 = vector.load %arg2[%c0_12, %19, %c0_13] : memref<1x8x32xf32, #tpu.memory_space<vmem>>, vector<1x1x32xf32>
    %21 = vector.shape_cast %20 : vector<1x1x32xf32> to vector<1x32xf32>
    %22 = vector.broadcast %21 : vector<1x32xf32> to vector<8x32xf32>
    %23 = arith.addf %22, %1 : vector<8x32xf32>
    %cst_14 = arith.constant 0.000000e+00 : f32
    %24 = vector.broadcast %cst_14 : f32 to vector<8x32xf32>
    %25 = arith.maximumf %23, %24 : vector<8x32xf32>
    %cst_15 = arith.constant dense<0.000000e+00> : vector<4x8xf32>
    %26 = tpu.matmul %2, %25, %cst_15 {dimension_numbers = #tpu.dot_dimension_numbers<[1], [1], [0], [0], [0, 0, 1, 0], [], []>} : vector<4x32xf32>, vector<8x32xf32>, vector<4x8xf32> -> vector<4x8xf32>
    %27 = arith.addf %26, %5 : vector<4x8xf32>
    %c0_16 = arith.constant 0 : index
    %28 = arith.index_cast %c1_i32 : i32 to index
    %c0_17 = arith.constant 0 : index
    %c0_18 = arith.constant 0 : index
    %29 = vector.load %arg6[%c0_16, %28, %c0_17, %c0_18] : memref<1x8x4x8xf32, #tpu.memory_space<vmem>>, vector<1x1x4x8xf32>
    %30 = vector.shape_cast %29 : vector<1x1x4x8xf32> to vector<4x8xf32>
    %31 = vector.shape_cast %27 : vector<4x8xf32> to vector<1x1x4x8xf32>
    tpu.vector_store %arg6[%c0_16, %28, %c0_17, %c0_18], %31 {strides = array<i32>} : memref<1x8x4x8xf32, #tpu.memory_space<vmem>>, vector<1x1x4x8xf32>,
    %c2_i32 = arith.constant 2 : i32
    %c0_19 = arith.constant 0 : index
    %32 = arith.index_cast %c2_i32 : i32 to index
    %c0_20 = arith.constant 0 : index
    %33 = vector.load %arg2[%c0_19, %32, %c0_20] : memref<1x8x32xf32, #tpu.memory_space<vmem>>, vector<1x1x32xf32>
    %34 = vector.shape_cast %33 : vector<1x1x32xf32> to vector<1x32xf32>
    %35 = vector.broadcast %34 : vector<1x32xf32> to vector<8x32xf32>
    %36 = arith.addf %35, %1 : vector<8x32xf32>
    %cst_21 = arith.constant 0.000000e+00 : f32
    %37 = vector.broadcast %cst_21 : f32 to vector<8x32xf32>
    %38 = arith.maximumf %36, %37 : vector<8x32xf32>
    %cst_22 = arith.constant dense<0.000000e+00> : vector<4x8xf32>
    %39 = tpu.matmul %2, %38, %cst_22 {dimension_numbers = #tpu.dot_dimension_numbers<[1], [1], [0], [0], [0, 0, 1, 0], [], []>} : vector<4x32xf32>, vector<8x32xf32>, vector<4x8xf32> -> vector<4x8xf32>
    %40 = arith.addf %39, %5 : vector<4x8xf32>
    %c0_23 = arith.constant 0 : index
    %41 = arith.index_cast %c2_i32 : i32 to index
    %c0_24 = arith.constant 0 : index
    %c0_25 = arith.constant 0 : index
    %42 = vector.load %arg6[%c0_23, %41, %c0_24, %c0_25] : memref<1x8x4x8xf32, #tpu.memory_space<vmem>>, vector<1x1x4x8xf32>
    %43 = vector.shape_cast %42 : vector<1x1x4x8xf32> to vector<4x8xf32>
    %44 = vector.shape_cast %40 : vector<4x8xf32> to vector<1x1x4x8xf32>
    tpu.vector_store %arg6[%c0_23, %41, %c0_24, %c0_25], %44 {strides = array<i32>} : memref<1x8x4x8xf32, #tpu.memory_space<vmem>>, vector<1x1x4x8xf32>,
    %c3_i32 = arith.constant 3 : i32
    %c0_26 = arith.constant 0 : index
    %45 = arith.index_cast %c3_i32 : i32 to index
    %c0_27 = arith.constant 0 : index
    %46 = vector.load %arg2[%c0_26, %45, %c0_27] : memref<1x8x32xf32, #tpu.memory_space<vmem>>, vector<1x1x32xf32>
    %47 = vector.shape_cast %46 : vector<1x1x32xf32> to vector<1x32xf32>
    %48 = vector.broadcast %47 : vector<1x32xf32> to vector<8x32xf32>
    %49 = arith.addf %48, %1 : vector<8x32xf32>
    %cst_28 = arith.constant 0.000000e+00 : f32
    %50 = vector.broadcast %cst_28 : f32 to vector<8x32xf32>
    %51 = arith.maximumf %49, %50 : vector<8x32xf32>
    %cst_29 = arith.constant dense<0.000000e+00> : vector<4x8xf32>
    %52 = tpu.matmul %2, %51, %cst_29 {dimension_numbers = #tpu.dot_dimension_numbers<[1], [1], [0], [0], [0, 0, 1, 0], [], []>} : vector<4x32xf32>, vector<8x32xf32>, vector<4x8xf32> -> vector<4x8xf32>
    %53 = arith.addf %52, %5 : vector<4x8xf32>
    %c0_30 = arith.constant 0 : index
    %54 = arith.index_cast %c3_i32 : i32 to index
    %c0_31 = arith.constant 0 : index
    %c0_32 = arith.constant 0 : index
    %55 = vector.load %arg6[%c0_30, %54, %c0_31, %c0_32] : memref<1x8x4x8xf32, #tpu.memory_space<vmem>>, vector<1x1x4x8xf32>
    %56 = vector.shape_cast %55 : vector<1x1x4x8xf32> to vector<4x8xf32>
    %57 = vector.shape_cast %53 : vector<4x8xf32> to vector<1x1x4x8xf32>
    tpu.vector_store %arg6[%c0_30, %54, %c0_31, %c0_32], %57 {strides = array<i32>} : memref<1x8x4x8xf32, #tpu.memory_space<vmem>>, vector<1x1x4x8xf32>,
    %c4_i32 = arith.constant 4 : i32
    %c0_33 = arith.constant 0 : index
    %58 = arith.index_cast %c4_i32 : i32 to index
    %c0_34 = arith.constant 0 : index
    %59 = vector.load %arg2[%c0_33, %58, %c0_34] : memref<1x8x32xf32, #tpu.memory_space<vmem>>, vector<1x1x32xf32>
    %60 = vector.shape_cast %59 : vector<1x1x32xf32> to vector<1x32xf32>
    %61 = vector.broadcast %60 : vector<1x32xf32> to vector<8x32xf32>
    %62 = arith.addf %61, %1 : vector<8x32xf32>
    %cst_35 = arith.constant 0.000000e+00 : f32
    %63 = vector.broadcast %cst_35 : f32 to vector<8x32xf32>
    %64 = arith.maximumf %62, %63 : vector<8x32xf32>
    %cst_36 = arith.constant dense<0.000000e+00> : vector<4x8xf32>
    %65 = tpu.matmul %2, %64, %cst_36 {dimension_numbers = #tpu.dot_dimension_numbers<[1], [1], [0], [0], [0, 0, 1, 0], [], []>} : vector<4x32xf32>, vector<8x32xf32>, vector<4x8xf32> -> vector<4x8xf32>
    %66 = arith.addf %65, %5 : vector<4x8xf32>
    %c0_37 = arith.constant 0 : index
    %67 = arith.index_cast %c4_i32 : i32 to index
    %c0_38 = arith.constant 0 : index
    %c0_39 = arith.constant 0 : index
    %68 = vector.load %arg6[%c0_37, %67, %c0_38, %c0_39] : memref<1x8x4x8xf32, #tpu.memory_space<vmem>>, vector<1x1x4x8xf32>
    %69 = vector.shape_cast %68 : vector<1x1x4x8xf32> to vector<4x8xf32>
    %70 = vector.shape_cast %66 : vector<4x8xf32> to vector<1x1x4x8xf32>
    tpu.vector_store %arg6[%c0_37, %67, %c0_38, %c0_39], %70 {strides = array<i32>} : memref<1x8x4x8xf32, #tpu.memory_space<vmem>>, vector<1x1x4x8xf32>,
    %c5_i32 = arith.constant 5 : i32
    %c0_40 = arith.constant 0 : index
    %71 = arith.index_cast %c5_i32 : i32 to index
    %c0_41 = arith.constant 0 : index
    %72 = vector.load %arg2[%c0_40, %71, %c0_41] : memref<1x8x32xf32, #tpu.memory_space<vmem>>, vector<1x1x32xf32>
    %73 = vector.shape_cast %72 : vector<1x1x32xf32> to vector<1x32xf32>
    %74 = vector.broadcast %73 : vector<1x32xf32> to vector<8x32xf32>
    %75 = arith.addf %74, %1 : vector<8x32xf32>
    %cst_42 = arith.constant 0.000000e+00 : f32
    %76 = vector.broadcast %cst_42 : f32 to vector<8x32xf32>
    %77 = arith.maximumf %75, %76 : vector<8x32xf32>
    %cst_43 = arith.constant dense<0.000000e+00> : vector<4x8xf32>
    %78 = tpu.matmul %2, %77, %cst_43 {dimension_numbers = #tpu.dot_dimension_numbers<[1], [1], [0], [0], [0, 0, 1, 0], [], []>} : vector<4x32xf32>, vector<8x32xf32>, vector<4x8xf32> -> vector<4x8xf32>
    %79 = arith.addf %78, %5 : vector<4x8xf32>
    %c0_44 = arith.constant 0 : index
    %80 = arith.index_cast %c5_i32 : i32 to index
    %c0_45 = arith.constant 0 : index
    %c0_46 = arith.constant 0 : index
    %81 = vector.load %arg6[%c0_44, %80, %c0_45, %c0_46] : memref<1x8x4x8xf32, #tpu.memory_space<vmem>>, vector<1x1x4x8xf32>
    %82 = vector.shape_cast %81 : vector<1x1x4x8xf32> to vector<4x8xf32>
    %83 = vector.shape_cast %79 : vector<4x8xf32> to vector<1x1x4x8xf32>
    tpu.vector_store %arg6[%c0_44, %80, %c0_45, %c0_46], %83 {strides = array<i32>} : memref<1x8x4x8xf32, #tpu.memory_space<vmem>>, vector<1x1x4x8xf32>,
    %c6_i32 = arith.constant 6 : i32
    %c0_47 = arith.constant 0 : index
    %84 = arith.index_cast %c6_i32 : i32 to index
    %c0_48 = arith.constant 0 : index
    %85 = vector.load %arg2[%c0_47, %84, %c0_48] : memref<1x8x32xf32, #tpu.memory_space<vmem>>, vector<1x1x32xf32>
    %86 = vector.shape_cast %85 : vector<1x1x32xf32> to vector<1x32xf32>
    %87 = vector.broadcast %86 : vector<1x32xf32> to vector<8x32xf32>
    %88 = arith.addf %87, %1 : vector<8x32xf32>
    %cst_49 = arith.constant 0.000000e+00 : f32
    %89 = vector.broadcast %cst_49 : f32 to vector<8x32xf32>
    %90 = arith.maximumf %88, %89 : vector<8x32xf32>
    %cst_50 = arith.constant dense<0.000000e+00> : vector<4x8xf32>
    %91 = tpu.matmul %2, %90, %cst_50 {dimension_numbers = #tpu.dot_dimension_numbers<[1], [1], [0], [0], [0, 0, 1, 0], [], []>} : vector<4x32xf32>, vector<8x32xf32>, vector<4x8xf32> -> vector<4x8xf32>
    %92 = arith.addf %91, %5 : vector<4x8xf32>
    %c0_51 = arith.constant 0 : index
    %93 = arith.index_cast %c6_i32 : i32 to index
    %c0_52 = arith.constant 0 : index
    %c0_53 = arith.constant 0 : index
    %94 = vector.load %arg6[%c0_51, %93, %c0_52, %c0_53] : memref<1x8x4x8xf32, #tpu.memory_space<vmem>>, vector<1x1x4x8xf32>
    %95 = vector.shape_cast %94 : vector<1x1x4x8xf32> to vector<4x8xf32>
    %96 = vector.shape_cast %92 : vector<4x8xf32> to vector<1x1x4x8xf32>
    tpu.vector_store %arg6[%c0_51, %93, %c0_52, %c0_53], %96 {strides = array<i32>} : memref<1x8x4x8xf32, #tpu.memory_space<vmem>>, vector<1x1x4x8xf32>,
    %c7_i32 = arith.constant 7 : i32
    %c0_54 = arith.constant 0 : index
    %97 = arith.index_cast %c7_i32 : i32 to index
    %c0_55 = arith.constant 0 : index
    %98 = vector.load %arg2[%c0_54, %97, %c0_55] : memref<1x8x32xf32, #tpu.memory_space<vmem>>, vector<1x1x32xf32>
    %99 = vector.shape_cast %98 : vector<1x1x32xf32> to vector<1x32xf32>
    %100 = vector.broadcast %99 : vector<1x32xf32> to vector<8x32xf32>
    %101 = arith.addf %100, %1 : vector<8x32xf32>
    %cst_56 = arith.constant 0.000000e+00 : f32
    %102 = vector.broadcast %cst_56 : f32 to vector<8x32xf32>
    %103 = arith.maximumf %101, %102 : vector<8x32xf32>
    %cst_57 = arith.constant dense<0.000000e+00> : vector<4x8xf32>
    %104 = tpu.matmul %2, %103, %cst_57 {dimension_numbers = #tpu.dot_dimension_numbers<[1], [1], [0], [0], [0, 0, 1, 0], [], []>} : vector<4x32xf32>, vector<8x32xf32>, vector<4x8xf32> -> vector<4x8xf32>
    %105 = arith.addf %104, %5 : vector<4x8xf32>
    %c0_58 = arith.constant 0 : index
    %106 = arith.index_cast %c7_i32 : i32 to index
    %c0_59 = arith.constant 0 : index
    %c0_60 = arith.constant 0 : index
    %107 = vector.load %arg6[%c0_58, %106, %c0_59, %c0_60] : memref<1x8x4x8xf32, #tpu.memory_space<vmem>>, vector<1x1x4x8xf32>
    %108 = vector.shape_cast %107 : vector<1x1x4x8xf32> to vector<4x8xf32>
    %109 = vector.shape_cast %105 : vector<4x8xf32> to vector<1x1x4x8xf32>
    tpu.vector_store %arg6[%c0_58, %106, %c0_59, %c0_60], %109 {strides = array<i32>} : memref<1x8x4x8xf32, #tpu.memory_space<vmem>>, vector<1x1x4x8xf32>,
    %c8_i32 = arith.constant 8 : i32
    return
  }
  func.func @transform_0(%arg0: i32, %arg1: i32) -> (i32, i32, i32) {
    %c0_i32 = arith.constant 0 : i32
    %c0_i32_0 = arith.constant 0 : i32
    return %arg0, %arg1, %c0_i32 : i32, i32, i32
  }
  func.func @transform_1(%arg0: i32, %arg1: i32) -> (i32, i32, i32) {
    %c0_i32 = arith.constant 0 : i32
    %c0_i32_0 = arith.constant 0 : i32
    %c0_i32_1 = arith.constant 0 : i32
    return %arg0, %c0_i32, %c0_i32_0 : i32, i32, i32
  }
  func.func @transform_2(%arg0: i32, %arg1: i32) -> (i32, i32) {
    %c0_i32 = arith.constant 0 : i32
    %c0_i32_0 = arith.constant 0 : i32
    %c0_i32_1 = arith.constant 0 : i32
    return %c0_i32, %c0_i32_0 : i32, i32
  }
  func.func @transform_3(%arg0: i32, %arg1: i32) -> (i32, i32) {
    %c0_i32 = arith.constant 0 : i32
    %c0_i32_0 = arith.constant 0 : i32
    %c0_i32_1 = arith.constant 0 : i32
    return %c0_i32, %c0_i32_0 : i32, i32
  }
  func.func @transform_4(%arg0: i32, %arg1: i32) -> (i32, i32, i32, i32) {
    %c0_i32 = arith.constant 0 : i32
    %c0_i32_0 = arith.constant 0 : i32
    %c0_i32_1 = arith.constant 0 : i32
    return %arg0, %arg1, %c0_i32, %c0_i32_0 : i32, i32, i32, i32
  }
}

</mosaic_0001>

<bundles_post_ra>
// kernel: tpu_custom_call.1
= control target key start
LH: loop header
LB: loop body
LE: loop exit
PB: predicated region body
PF: predicated region fallthrough
CT: control target
= control target key end

     0   :  { %9 = vsyncpa [#allocation3], 0  ;;  %s1690_s0 = inlined_call_operand.hbm [shape: f32[2,8,32], index: 0, kind: input, shape index: {}]   ;;  %s1691_s1 = inlined_call_operand.hbm [shape: f32[2,8,32], index: 1, kind: input, shape index: {}]   ;;  %s1692_s2 = inlined_call_operand.vmem [shape: f32[4,32], index: 2, kind: input, shape index: {}]   ;;  %s1693_s3 = inlined_call_operand.vmem [shape: f32[4,1], index: 3, kind: input, shape index: {}]   ;;  %s1694_s4 = inlined_call_operand.hbm [shape: f32[2,8,4,8], index: 4, kind: output, shape index: {}]  }
   0x1   :  { %11 = vsyncpa [#allocation3 + $0x1], 0 }
   0x2   :  { %12 = vsyncpa [#allocation6], 0 }
   0x3   :  { %14 = vsyncpa [#allocation6 + $0x1], 0 }
   0x4   :  { %15 = vsyncpa [#allocation4], 0 }
   0x5   :  { %17 = vsyncpa [#allocation4 + $0x1], 0  ;;  %s1419_s15 = smov 0   ;;  %s1421_s16 = smov 0  }
   0x6   :  { %s1423_s17 = smov 0   ;;  %s1425_s18 = smov 0  }
   0x7   :  { %s1427_s19 = smov 0   ;;  %s1429_s20 = smov 0  }
   0x8 LB: > { %s1060_s21 = sadd.s32 4294967295, %s1384_s20   ;;  %s1061_s22 = sadd.s32 4294967294, %s1384_s20   ;;  %s1384_s20 = sphi %s1429_s20, %s23_s20   ;;  %s1380_s19 = sphi %s1427_s19, %s1714_s19   ;;  %s1376_s18 = sphi %s1425_s18, %s1713_s18   ;;  %s1372_s17 = sphi %s1423_s17, %s1712_s17   ;;  %s1368_s16 = sphi %s1421_s16, %s1711_s16   ;;  %s1364_s15 = sphi %s1419_s15, %s1710_s15  }
   0x9   : > { %s35_s23 = sadd.s32 1, %s1380_s19  ;;  %s44_s24 = sadd.s32 1, %s1372_s17 }
   0xa   : > { %p37_p0 = scmp.ge.s32.totalorder %s35_s23, 2  ;;  %p51_p1 = scmp.ne.s32.totalorder %s1372_s17, %s1368_s16 }
   0xb   : > { %p52_p2 = scmp.eq.s32.totalorder %s1384_s20, 0  ;;  %p57_p3 = scmp.ne.s32.totalorder %s1368_s16, %s1364_s15 }
   0xc   : > { %s1716_s23 = smov (%p37_p0, %s35_s23), 0  ;;  %p58_p5 = scmp.eq.s32.totalorder %s1060_s21, 0 }
   0xd   : > { %p1460_p4 = por %p52_p2, %p51_p1  ;;  %s39_s26 = ssub.s32 %s1380_s19, %s1716_s23 }
   0xe   : > { %p151_p6 = scmp.eq.s32.totalorder %s1060_s21, 1  ;;  %p42_p7 = scmp.eq.s32.totalorder %s39_s26, 0 }
   0xf   : > { %p1466_p8 = por %p58_p5, %p57_p3  ;;  %p157_p10 = scmp.eq.s32.totalorder %s1061_s22, 1 }
  0x10   : > { %p1470_p9 = por %p151_p6, %p51_p1  ;;  %p1182_p13 = scmp.lt.s32.totalorder %s1384_s20, 2 }
  0x11   : > { %s1698_s27 = scalar_select %p1466_p8, 1, 0 }
  0x12   : > { %s1699_s28 = scalar_select %p1470_p9, 1, 0 }
  0x13   : > { %s1475_s29 = scalar_select %p42_p7, %s1372_s17, %s44_s24  }
  0x14   : > { %p1477_p11 = por %p157_p10, %p57_p3  ;;  %s1484_s5 = sand.u32 1, %s1372_s17  }
  0x15   : > { %s1064_s6 = sshll.u32 %s1484_s5, 3  ;;  %s1065_s7 = sshll.u32 %s1380_s19, 7 }
  0x16   : > { %s1700_s30 = scalar_select %p1477_p11, 1, 0 }
  0x17   : > { %s1493_s10 = scalar_lea.hbm %s1690_s0, %s1065_s7  ;;  %s187_s11 = scalar_lea.vmem [#allocation2], %s1064_s6 }
  0x18   : > { %s195_s12 = sshll.u32 %s187_s11, 4  ;;  %p1501_p0 = pnand %p1182_p13, %p1460_p4  ;;  %s1497_s12 = int_to_ptr.vmem [resolvable:$true] %s195_s12 }
  0x19   : > { %s184_s14 = scalar_lea.sflag [#allocation3], %s1484_s5  ;;  %s1238_s21 = scalar_lea.hbm %s1493_s10, 128 }
  0x1a   : > { %p1239_p3 = scmp.ne.s32.totalorder %s1493_s10, %s1238_s21  ;;  %p1240_p5 = pneg %p1501_p0 }
  0x1b   : > { %s1243_s25 = scalar_lea.hbm %s1690_s0, 256  ;;  %p1244_p4 = scmp.lt.u32.totalorder %s1493_s10, %s1690_s0 }
  0x1c   : > { %p1241_p6 = pnand %p1240_p5, %p1239_p3  ;;  %p1245_p10 = scmp.lt.u32.totalorder %s1243_s25, %s1238_s21 }
  0x1d   : > { %p1247_p12 = scmp.lt.u32.totalorder %s1238_s21, %s1493_s10 }
  0x1e   : > { %p1242_p7 = pneg %p1241_p6  ;;  %p1246_p13 = por %p1245_p10, %p1244_p4 }
  0x20   : > { %p1248_p1 = por %p1247_p12, %p1246_p13 }
  0x22   : > { %p1249_p2 = pnand %p1248_p1, %p1242_p7 }
  0x24   : > { %1252 = shalt.err (!%p1249_p2)
}
  0x25   : > { %s1253_s9 = scalar_lea.vmem %s1497_s12, 128  ;;  %s1386_s11 = smov [#allocation2]  }
  0x26   : > { %p1254_p3 = scmp.ne.s32.totalorder %s1497_s12, %s1253_s9  ;;  %s1258_s22 = sshll.u32 %s1386_s11, 4  ;;  %s1259_s22 = int_to_ptr.vmem [resolvable:$false] %s1258_s22 }
  0x27   : > { %s1260_s24 = scalar_lea.vmem %s1259_s22, 256  ;;  %p1261_p9 = scmp.lt.s32.totalorder %s1497_s12, %s1259_s22 }
  0x28   : > { %p1256_p6 = pnand %p1254_p3, %p1240_p5  ;;  %p1262_p4 = scmp.lt.s32.totalorder %s1260_s24, %s1253_s9 }
  0x2a   : > { %p1257_p11 = pneg %p1256_p6  ;;  %p1263_p10 = por %p1262_p4, %p1261_p9 }
  0x2c   : > { %p1264_p12 = pnand %p1263_p10, %p1257_p11 }
  0x2e   : > { %1267 = shalt.err (!%p1264_p12)
}
  0x2f   : > { %1174 = dma.hbm_to_vmem [thread:$0]  (!%p1501_p0), %s1493_s10, 128, %s1497_s12, %s184_s14  }
  0x30   : > { %p1702_p1 = scmp.lt.s32.totalorder %s1384_s20, 3  ;;  %p1703_p2 = scmp.ge.s32.totalorder %s1384_s20, 1 }
  0x31   : > { %s1546_s8 = scalar_lea.hbm %s1691_s1, %s1065_s7  ;;  %s206_s9 = scalar_lea.vmem [#allocation5], %s1064_s6 }
  0x32   : > { %p1537_p7 = pnand %p1703_p2, %p1702_p1  ;;  %s213_s11 = sshll.u32 %s206_s9, 4  ;;  %s214_s11 = int_to_ptr.vmem [resolvable:$true] %s213_s11 }
  0x33   : > { %s203_s10 = scalar_lea.sflag [#allocation6], %s1484_s5  ;;  %s1268_s12 = scalar_lea.hbm %s1546_s8, 128 }
  0x34   : > { %s1704_s21 = scalar_select %p1537_p7, 1, 0 }
  0x35   : > { %p1269_p9 = scmp.ne.s32.totalorder %s1546_s8, %s1268_s12  ;;  %s1273_s7 = scalar_lea.hbm %s1691_s1, 256 }
  0x36   : > { %p1274_p3 = scmp.lt.u32.totalorder %s1546_s8, %s1691_s1  ;;  %p1275_p6 = scmp.lt.u32.totalorder %s1273_s7, %s1268_s12 }
  0x37   : > { %p1271_p11 = pnand %p1269_p9, %p1240_p5  ;;  %p1277_p10 = scmp.lt.u32.totalorder %s1268_s12, %s1546_s8 }
  0x38   : > { %p1276_p4 = por %p1275_p6, %p1274_p3 }
  0x39   : > { %p1272_p13 = pneg %p1271_p11 }
  0x3a   : > { %p1278_p12 = por %p1277_p10, %p1276_p4 }
  0x3c   : > { %p1279_p1 = pnand %p1278_p12, %p1272_p13 }
  0x3e   : > { %1282 = shalt.err (!%p1279_p1)
}
  0x3f   : > { %s1283_s5 = scalar_lea.vmem %s214_s11, 128  ;;  %s1387_s6 = smov [#allocation5]  }
  0x40   : > { %p1284_p2 = scmp.ne.s32.totalorder %s214_s11, %s1283_s5  ;;  %s1288_s26 = sshll.u32 %s1387_s6, 4  ;;  %s1289_s26 = int_to_ptr.vmem [resolvable:$false] %s1288_s26 }
  0x41   : > { %s1290_s9 = scalar_lea.vmem %s1289_s26, 256  ;;  %p1291_p8 = scmp.lt.s32.totalorder %s214_s11, %s1289_s26 }
  0x42   : > { %p1286_p9 = pnand %p1284_p2, %p1240_p5  ;;  %p1292_p7 = scmp.lt.s32.totalorder %s1290_s9, %s1283_s5 }
  0x44   : > { %p1287_p11 = pneg %p1286_p9  ;;  %p1293_p3 = por %p1292_p7, %p1291_p8 }
  0x46   : > { %p1294_p6 = pnand %p1293_p3, %p1287_p11 }
  0x48   : > { %1297 = shalt.err (!%p1294_p6)
}
  0x49   : > { %1177 = dma.hbm_to_vmem [thread:$0]  (!%p1501_p0), %s1546_s8, 128, %s214_s11, %s203_s10  }
  0x4a   : > { %p1705_p13 = scmp.ne.s32.totalorder %s1704_s21, 0 }
  0x4b   : > { %s1573_s12 = sand.u32 (!%p1705_p13), 1, %s1368_s16   ;;  %p1706_p8 = scmp.ne.s32.totalorder (!%p1705_p13), %s1698_s27, 0 }
  0x4c   : > { %222 = sbr.rel (%p1705_p13) target bundleno = 336 (0x150), region = 36  ;;  %s1069_s14 = sshll.u32 (!%p1705_p13), %s1573_s12, 3 }
  0x4d   : > { %s225_s22 = scalar_lea.sflag (!%p1705_p13), [#allocation3], %s1573_s12  ;;  %s1577_s7 = scalar_lea.vmem (!%p1705_p13), [#allocation2], %s1069_s14 }
  0x53   : > { %1351 = dma.done.wait (%p1706_p8), %s225_s22, 128  }
  0x54   : > { %1353 = vsyncadd (%p1706_p8), %s225_s22, 4294967168  ;;  %s234_s13 = scalar_lea.sflag [#allocation6], %s1573_s12  ;;  %s237_s21 = scalar_lea.vmem [#allocation5], %s1069_s14 }
  0x55   : > { %1355 = dma.done.wait (%p1706_p8), %s234_s13, 128  }
  0x56   : > { %1357 = vsyncadd (%p1706_p8), %s234_s13, 4294967168  ;;  %v1388_v0 = vmov 0.0   ;;  %vm1389_vm0 = vmmov 0   ;;  %v1390_v1 = vmov 0   ;;  %v268_v2 = vld [vmem:[%s237_s21] sm:$0xff]  ;;  %vm283_vm1 = vcmask 261120  }
  0x57   : > { %1125 = vmatprep.subr.mxu0 %v1388_v0  ;;  %1130 = vmatprep.subr.mxu1 %v1388_v0  ;;  %v1072_v3 = vld [vmem:[%s1577_s7] ss:$0 sm:$0xff]  ;;  %v1075_v4 = vld [vmem:[%s1577_s7 + $0x1] ss:$0 sm:$0xff]  ;;  %v1079_v7 = vld [vmem:[%s1577_s7 + $0x2] ss:$0 sm:$0xff] }
  0x58   : > { %1127 = vmatprep.mubr.msk.f32.mxu0 %vm1389_vm0, %v1388_v0  ;;  %1132 = vmatprep.mubr.msk.f32.mxu1 %vm1389_vm0, %v1388_v0  ;;  %v281_v5 = vadd.f32 %v1072_v3, %v268_v2  ;;  %v367_v6 = vadd.f32 %v1075_v4, %v268_v2  ;;  %v1083_v8 = vld [vmem:[%s1577_s7 + $0x3] ss:$0 sm:$0xff]  ;;  %v449_v9 = vadd.f32 %v1079_v7, %v268_v2  ;;  %v1087_v11 = vld [vmem:[%s1577_s7 + $0x4] ss:$0 sm:$0xff]  ;;  %v1091_v12 = vld [vmem:[%s1577_s7 + $0x5] ss:$0 sm:$0xff] }
  0x59   : > { %1237 = vset.pattern.permute.xlu0 %v1390_v1  ;;  %v531_v10 = vadd.f32 %v1083_v8, %v268_v2  ;;  %v270_v15 = vld [vmem:[%s1693_s3] sm:$0xf]  ;;  %v613_v19 = vadd.f32 %v1087_v11, %v268_v2  ;;  %v695_v20 = vadd.f32 %v1091_v12, %v268_v2  ;;  %v1095_v21 = vld [vmem:[%s1577_s7 + $0x6] ss:$0 sm:$0xff]  ;;  %v1099_v22 = vld [vmem:[%s1577_s7 + $0x7] ss:$0 sm:$0xff] }
  0x5a   : > { %v282_v13 = vmax.f32 %v281_v5, 0.0  ;;  %v368_v14 = vmax.f32 %v367_v6, 0.0  ;;  %273 = vperm.xlu0 %1237, %v270_v15   ;;  %v269_v16 = vld [vmem:[%s1692_s2] sm:$0xf]  ;;  %v450_v17 = vmax.f32 %v449_v9, 0.0  ;;  %v777_v25 = vadd.f32 %v1095_v21, %v268_v2  ;;  %s1071_s24 = sshll.u32 %s1573_s12, 5 }
  0x5b   : > { %v532_v18 = vmax.f32 %v531_v10, 0.0  ;;  %v614_v23 = vmax.f32 %v613_v19, 0.0  ;;  %v696_v24 = vmax.f32 %v695_v20, 0.0  ;;  %v859_v26 = vadd.f32 %v1099_v22, %v268_v2  ;;  %s266_s25 = scalar_lea.vmem [#allocation7], %s1071_s24  ;;  %s1108_s5 = sshll.u32 %s1376_s18, 9 }
  0x5c   : > { %1126 = vmatpush3.xpose.msk.msra.mxu0 %vm283_vm1, %v282_v13  ;;  %1131 = vmatpush3.xpose.msk.msra.mxu1 %vm283_vm1, %v368_v14  ;;  %v778_v27 = vmax.f32 %v777_v25, 0.0  ;;  %vm360_vm2 = vcmask 60416   ;;  %s952_s6 = sshll.u32 %s266_s25, 4  ;;  %s1637_s14 = scalar_lea.hbm %s1694_s4, %s1108_s5  ;;  %s1639_s6 = int_to_ptr.vmem [resolvable:$true] %s952_s6 }
  0x5d   : > { %1135 = vmatprep.subr.mxu0 %v1388_v0  ;;  %1140 = vmatprep.subr.mxu1 %v1388_v0  ;;  %v860_v28 = vmax.f32 %v859_v26, 0.0  ;;  %s937_s18 = scalar_lea.sflag [#allocation4], %s1573_s12  ;;  %s1298_s22 = scalar_lea.vmem %s1639_s6, 512 }
  0x5e   : > { %p1299_p0 = scmp.ne.s32.totalorder %s1639_s6, %s1298_s22  ;;  %p1707_p5 = scmp.ne.s32.totalorder %s1699_s28, 0 }
  0x5f   : > { %1128 = vmatmul.mubr.msk.f32.vlgmr.msra.gmra.mrb[0].mxu0 %vm283_vm1, %v269_v16  ;;  %1133 = vmatmul.mubr.msk.f32.vlgmr.msra.gmra.mrb[0].mxu1 %vm283_vm1, %v269_v16  ;;  %s1391_s7 = smov [#allocation7]  }
  0x60   : > { %1136 = vmatpush3.xpose.msk.msra.mxu0 %vm283_vm1, %v450_v17  ;;  %1141 = vmatpush3.xpose.msk.msra.mxu1 %vm283_vm1, %v532_v18  ;;  %p1300_p7 = pnand %p1299_p0, %p1707_p5  ;;  %s1302_s13 = sshll.u32 %s1391_s7, 4  ;;  %s1303_s13 = int_to_ptr.vmem [resolvable:$false] %s1302_s13 }
  0x61   : > { %1137 = vmatprep.mubr.msk.f32.mxu0 %vm1389_vm0, %v1388_v0  ;;  %1142 = vmatprep.mubr.msk.f32.mxu1 %vm1389_vm0, %v1388_v0  ;;  %s1304_s21 = scalar_lea.vmem %s1303_s13, 1024  ;;  %p1305_p10 = scmp.lt.s32.totalorder %s1639_s6, %s1303_s13 }
  0x62   : > { %1145 = vmatprep.subr.mxu0 %v1388_v0  ;;  %1150 = vmatprep.subr.mxu1 %v1388_v0  ;;  %p1301_p4 = pneg %p1300_p7  ;;  %p1306_p12 = scmp.lt.s32.totalorder %s1304_s21, %s1298_s22 }
  0x63   : > { %1138 = vmatmul.mubr.msk.f32.vlgmr.msra.gmra.mrb[2].mxu0 %vm283_vm1, %v269_v16  ;;  %1143 = vmatmul.mubr.msk.f32.vlgmr.msra.gmra.mrb[2].mxu1 %vm283_vm1, %v269_v16 }
  0x64   : > { %1146 = vmatpush3.xpose.msk.msra.mxu0 %vm283_vm1, %v614_v23  ;;  %1151 = vmatpush3.xpose.msk.msra.mxu1 %vm283_vm1, %v696_v24  ;;  %p1307_p1 = por %p1306_p12, %p1305_p10 }
  0x65   : > { %1147 = vmatprep.mubr.msk.f32.mxu0 %vm1389_vm0, %v1388_v0  ;;  %1152 = vmatprep.mubr.msk.f32.mxu1 %vm1389_vm0, %v1388_v0 }
  0x66   : > { %1155 = vmatprep.subr.mxu0 %v1388_v0  ;;  %1160 = vmatprep.subr.mxu1 %v1388_v0  ;;  %p1308_p2 = pnand %p1307_p1, %p1301_p4 }
  0x67   : > { %1148 = vmatmul.mubr.msk.f32.vlgmr.msra.gmra.mrb[4].mxu0 %vm283_vm1, %v269_v16  ;;  %1153 = vmatmul.mubr.msk.f32.vlgmr.msra.gmra.mrb[4].mxu1 %vm283_vm1, %v269_v16 }
  0x68   : > { %1156 = vmatpush3.xpose.msk.msra.mxu0 %vm283_vm1, %v778_v27  ;;  %1161 = vmatpush3.xpose.msk.msra.mxu1 %vm283_vm1, %v860_v28 }
  0x69   : > { %1157 = vmatprep.mubr.msk.f32.mxu0 %vm1389_vm0, %v1388_v0  ;;  %1162 = vmatprep.mubr.msk.f32.mxu1 %vm1389_vm0, %v1388_v0 }
  0x6b   : > { %1158 = vmatmul.mubr.msk.f32.vlgmr.msra.gmra.mrb[6].mxu0 %vm283_vm1, %v269_v16  ;;  %1163 = vmatmul.mubr.msk.f32.vlgmr.msra.gmra.mrb[6].mxu1 %vm283_vm1, %v269_v16 }
  0xd9   : > { %v274_v29 = vpop.permute.xlu0 %273 }
 0x132   : > { %v356_v30 = vpop.f32.mrb[0].mxu0  ;;  %v438_v31 = vpop.f32.mrb[0].mxu1 }
 0x133   : > { %v357_v32 = vadd.f32 %v356_v30, %v274_v29  ;;  %v439_v33 = vadd.f32 %v438_v31, %v274_v29  ;;  %v1129_v34 = vpop.f32.mrb[1].mxu0  ;;  %v1134_v35 = vpop.f32.mrb[1].mxu1 }
 0x135   : > { %361 = vst.msk [vmem:[%s266_s25] sm:$0xf] %vm360_vm2, %v357_v32  ;;  %1078 = vst.msk [vmem:[%s266_s25 + $0x4] sm:$0xf] %vm360_vm2, %v439_v33 }
 0x136   : > { %v520_v36 = vpop.f32.mrb[2].mxu0  ;;  %v602_v37 = vpop.f32.mrb[2].mxu1 }
 0x137   : > { %v521_v38 = vadd.f32 %v520_v36, %v274_v29  ;;  %v603_v39 = vadd.f32 %v602_v37, %v274_v29  ;;  %v1139_v40 = vpop.f32.mrb[3].mxu0  ;;  %v1144_v41 = vpop.f32.mrb[3].mxu1 }
 0x139   : > { %1082 = vst.msk [vmem:[%s266_s25 + $0x8] sm:$0xf] %vm360_vm2, %v521_v38  ;;  %1086 = vst.msk [vmem:[%s266_s25 + $0xc] sm:$0xf] %vm360_vm2, %v603_v39 }
 0x13a   : > { %v684_v42 = vpop.f32.mrb[4].mxu0  ;;  %v766_v43 = vpop.f32.mrb[4].mxu1 }
 0x13b   : > { %v685_v44 = vadd.f32 %v684_v42, %v274_v29  ;;  %v767_v45 = vadd.f32 %v766_v43, %v274_v29  ;;  %v1149_v46 = vpop.f32.mrb[5].mxu0  ;;  %v1154_v47 = vpop.f32.mrb[5].mxu1 }
 0x13d   : > { %1090 = vst.msk [vmem:[%s266_s25 + $0x10] sm:$0xf] %vm360_vm2, %v685_v44  ;;  %1094 = vst.msk [vmem:[%s266_s25 + $0x14] sm:$0xf] %vm360_vm2, %v767_v45 }
 0x13e   : > { %v848_v48 = vpop.f32.mrb[6].mxu0  ;;  %v930_v49 = vpop.f32.mrb[6].mxu1 }
 0x13f   : > { %v849_v50 = vadd.f32 %v848_v48, %v274_v29  ;;  %v931_v51 = vadd.f32 %v930_v49, %v274_v29  ;;  %v1159_v52 = vpop.f32.mrb[7].mxu0  ;;  %v1164_v53 = vpop.f32.mrb[7].mxu1 }
 0x141   : > { %1098 = vst.msk [vmem:[%s266_s25 + $0x18] sm:$0xf] %vm360_vm2, %v849_v50  ;;  %1102 = vst.msk [vmem:[%s266_s25 + $0x1c] sm:$0xf] %vm360_vm2, %v931_v51 }
 0x142   : > { %1311 = shalt.err (!%p1308_p2)
}
 0x143   : > { %s1312_s27 = scalar_lea.hbm %s1637_s14, 512  ;;  %s1316_s10 = scalar_lea.hbm %s1694_s4, 1024 }
 0x144   : > { %p1313_p9 = scmp.ne.s32.totalorder %s1637_s14, %s1312_s27  ;;  %p1317_p6 = scmp.lt.u32.totalorder %s1637_s14, %s1694_s4 }
 0x145   : > { %p1318_p13 = scmp.lt.u32.totalorder %s1316_s10, %s1312_s27  ;;  %p1320_p0 = scmp.lt.u32.totalorder %s1312_s27, %s1637_s14 }
 0x146   : > { %p1314_p11 = pnand %p1313_p9, %p1707_p5 }
 0x147   : > { %p1319_p8 = por %p1318_p13, %p1317_p6 }
 0x148   : > { %p1315_p3 = pneg %p1314_p11 }
 0x149   : > { %p1321_p7 = por %p1320_p0, %p1319_p8 }
 0x14b   : > { %p1322_p4 = pnand %p1321_p7, %p1315_p3 }
 0x14d   : > { %1325 = shalt.err (!%p1322_p4)
}
 0x14e   : > { %s1392_s5 = smov 64   ;;  %s1393_s26 = smov 4  }
 0x14f   : > { %1169 = dma.vmem_to_hbm [thread:$0]  (%p1707_p5), %s1639_s6, 512, %s1637_s14, %s937_s18, %s1392_s5, %s1392_s5, %s1393_s26  }
 0x150 PF: > { %s967_s9 = sand.u32 1, %s1364_s15   ;;  %p1708_p10 = scmp.ne.s32.totalorder %s1700_s30, 0 }
 0x151   : > { %p1709_p12 = scmp.ge.s32.totalorder %s1384_s20, 2  ;;  %s968_s22 = scalar_lea.sflag [#allocation4], %s967_s9 }
 0x153   : > { %p1179_p1 = pnand %p1709_p12, %p1708_p10 }
 0x155   : > { %1359 = dma.done.wait (!%p1179_p1), %s968_s22, 512  }
 0x156   : > { %1361 = vsyncadd (!%p1179_p1), %s968_s22, 4294966784  ;;  %s23_s20 = sadd.s32 1, %s1384_s20   ;;  %s1710_s15 = smov %s1368_s16 }
 0x157   : > { %p20_p2 = scmp.ge.s32.totalorder %s23_s20, 4   ;;  %s1711_s16 = smov %s1372_s17 }
 0x158   : > { %s1712_s17 = smov %s1475_s29  ;;  %s1713_s18 = smov %s1380_s19 }
 0x159   : > { %s1714_s19 = smov %s1716_s23  ;;  %22 = sbr.rel (!%p20_p2) target bundleno = 8 (0x8), region = 101 }
 0x160   :  { %973 = vsyncpa [#allocation3], 1 }
 0x161   :  { %975 = vsyncpa [#allocation3 + $0x1], 1 }
 0x162   :  { %976 = vsyncpa [#allocation6], 1 }
 0x163   :  { %978 = vsyncpa [#allocation6 + $0x1], 1 }
 0x164   :  { %979 = vsyncpa [#allocation4], 1 }
 0x165   :  { %981 = vsyncpa [#allocation4 + $0x1], 1 }

</bundles_post_ra>
